<compile_context>
chip_gen: v5e
topology: v5e:2x2
jax: 0.10.0
libtpu: 0.0.40
codegen_flags: <defaults>
</compile_context>

<pallas_src>
import functools

import jax
import jax.numpy as jnp
from jax.experimental import pallas as pl
from jax.experimental.pallas import tpu as pltpu


def _round_up(x, m):
    return ((x + m - 1) // m) * m


def _choose_tiles(rows, hw, itemsize, target_bytes=4 * 1024 * 1024):
    """Byte-budget block chooser for the pooling kernel.

    rows (= b*c) map to sublanes, hw maps to lanes.  We pick the row tile from
    the dtype's packed-sublane unit (8 f32 / 16 bf16 / 32 int8), keep >= 2 row
    blocks when possible (v7x megacore), and then grow the lane tile until the
    block hits ~target_bytes.  Ragged remainders are handled by the cdiv grid
    plus in-kernel masking, so no divisibility of rows/hw is required.
    """
    sub = {4: 8, 2: 16, 1: 32}.get(itemsize, 8)
    if rows <= sub:
        tm = rows  # block equals the full row extent (allowed by Mosaic)
    else:
        tm = min(512, _round_up(rows, sub))
        if rows >= 2 * sub:
            # Guarantee at least two blocks on the parallel row axis.
            tm = min(tm, _round_up((rows + 1) // 2, sub))
    thw = target_bytes // max(tm * itemsize, 1)
    thw = max(128, (thw // 128) * 128)          # lane-dense, multiple of 128
    thw = min(thw, _round_up(hw, 128))          # never wider than needed
    return tm, thw


def _pool_kernel(x_ref, o_ref, sum_acc, max_acc, *, hw, thw, ragged):
    """Running sum + max over the spatial (lane) axis for a (tm, thw) tile."""
    s = pl.program_id(1)
    last = pl.num_programs(1) - 1

    @pl.when(s == 0)
    def _init():
        sum_acc[...] = jnp.zeros_like(sum_acc)
        max_acc[...] = jnp.full_like(max_acc, -jnp.inf)

    # DMA in native dtype; upcast in-register before accumulating (f32 acc).
    x = x_ref[...].astype(jnp.float32)

    if ragged:
        # Only the last spatial block is ragged; keep every other step mask-free.
        @pl.when(s != last)
        def _bulk():
            sum_acc[...] += jnp.sum(x, axis=-1, keepdims=True)
            max_acc[...] = jnp.maximum(
                max_acc[...], jnp.max(x, axis=-1, keepdims=True))

        @pl.when(s == last)
        def _tail():
            # OOB lanes of a ragged block are NOT guaranteed to be zero:
            # mask them to 0 for the sum and to -inf for the max.
            lane = jax.lax.broadcasted_iota(jnp.int32, x.shape, 1)
            valid = (s * thw + lane) < hw
            xs = jnp.where(valid, x, 0.0)
            xm = jnp.where(valid, x, -jnp.inf)
            sum_acc[...] += jnp.sum(xs, axis=-1, keepdims=True)
            max_acc[...] = jnp.maximum(
                max_acc[...], jnp.max(xm, axis=-1, keepdims=True))
    else:
        sum_acc[...] += jnp.sum(x, axis=-1, keepdims=True)
        max_acc[...] = jnp.maximum(
            max_acc[...], jnp.max(x, axis=-1, keepdims=True))

    @pl.when(s == last)
    def _finalize():
        # mean = running_sum * (1/hw) -- exact even with a ragged last tile.
        o_ref[...] = (sum_acc[...] * (1.0 / hw) + max_acc[...]).astype(o_ref.dtype)


def _conv_sigmoid_kernel(w_ref, p_ref, o_ref, *, k_size):
    """k-tap Conv1d over the channel (lane) axis + sigmoid on the pooled map.

    The conv (with implicit zero padding) is a banded (c, c) matrix built from
    iotas, so no wrapper-side pad/slice ops are needed.  w_ref is (k,) in SMEM.
    """
    p = p_ref[...].astype(jnp.float32)                      # (b, c)
    c = p.shape[-1]
    pad = (k_size - 1) // 2
    src = jax.lax.broadcasted_iota(jnp.int32, (c, c), 0)    # input channel j
    dst = jax.lax.broadcasted_iota(jnp.int32, (c, c), 1)    # output channel i
    band = jnp.zeros((c, c), jnp.float32)
    for k in range(k_size):                                 # tiny static loop
        band = band + w_ref[k] * (src == dst + (k - pad)).astype(jnp.float32)
    # y[:, i] = sum_k w[k] * p[:, i + k - pad], zero-padded at the edges.
    y = jnp.dot(p, band, preferred_element_type=jnp.float32)
    # F.interpolate back to the same (c, 1) size is an identity -> nothing to do.
    o_ref[...] = jax.nn.sigmoid(y).astype(o_ref.dtype)


def cab_forward(x, conv_w, k_size=3):
    """x: (b, c, h, w) NCHW; conv_w: (1, 1, k_size) Conv1d weight. Returns (b, c, 1, 1)."""
    b, c, h, w = x.shape
    hw = h * w
    rows = b * c
    itemsize = jnp.dtype(x.dtype).itemsize

    # ---------------- kernel 1: avg+max pooling over (b*c, hw) ----------------
    tm, thw = _choose_tiles(rows, hw, itemsize)
    x2 = x.reshape(rows, hw)                     # free bitcast, native dtype
    grid = (pl.cdiv(rows, tm), pl.cdiv(hw, thw))
    ragged = (hw % thw) != 0

    pooled = pl.pallas_call(
        functools.partial(_pool_kernel, hw=hw, thw=thw, ragged=ragged),
        out_shape=jax.ShapeDtypeStruct((rows, 1), jnp.float32),
        grid=grid,
        in_specs=[pl.BlockSpec((tm, thw), lambda r, s: (r, s))],
        out_specs=pl.BlockSpec((tm, 1), lambda r, s: (r, 0)),
        scratch_shapes=[pltpu.VMEM((tm, 1), jnp.float32),   # running sum
                        pltpu.VMEM((tm, 1), jnp.float32)],  # running max
        compiler_params=pltpu.CompilerParams(
            dimension_semantics=("parallel", "arbitrary")),
        cost_estimate=pl.CostEstimate(
            flops=2 * rows * hw,
            transcendentals=0,
            bytes_accessed=rows * hw * itemsize + rows * 4),
    )(x2)

    pooled_bc = pooled.reshape(b, c)             # free bitcast

    # ---------------- kernel 2: conv1d(k) over channels + sigmoid -------------
    w_flat = conv_w.reshape(k_size).astype(jnp.float32)

    cam = pl.pallas_call(
        functools.partial(_conv_sigmoid_kernel, k_size=k_size),
        out_shape=jax.ShapeDtypeStruct((b, c), x.dtype),
        in_specs=[pl.BlockSpec(memory_space=pltpu.MemorySpace.SMEM),
                  pl.BlockSpec(memory_space=pltpu.MemorySpace.VMEM)],
        out_specs=pl.BlockSpec(memory_space=pltpu.MemorySpace.VMEM),
    )(w_flat, pooled_bc)

    return cam.reshape(b, c, 1, 1)


def cab_ref(x, conv_w, k_size=3):
    """Pure-JAX reference mirroring the PyTorch module."""
    b, c, h, w = x.shape
    xf = x.astype(jnp.float32)
    pooled = jnp.mean(xf, axis=(2, 3)) + jnp.max(xf, axis=(2, 3))   # (b, c)
    pad = (k_size - 1) // 2
    pp = jnp.pad(pooled, ((0, 0), (pad, pad)))
    kern = conv_w.reshape(k_size).astype(jnp.float32)
    out = sum(kern[i] * pp[:, i:i + c] for i in range(k_size))
    return jax.nn.sigmoid(out).astype(x.dtype).reshape(b, c, 1, 1)


if __name__ == "__main__":
    key = jax.random.PRNGKey(0)
    kx, kw, kx2 = jax.random.split(key, 3)
    # Small NCHW input consistent with the module's forward.
    x = jax.random.normal(kx, (2, 4, 16, 16), dtype=jnp.float32)
    # Deterministic synthetic Conv1d(1, 1, 3, bias=False) weight.
    conv_w = 0.5 * jax.random.normal(kw, (1, 1, 3), dtype=jnp.float32)

    out = cab_forward(x, conv_w)
    jax.block_until_ready(out)
    assert out.shape == (2, 4, 1, 1)
    assert jnp.allclose(out, cab_ref(x, conv_w), rtol=1e-5, atol=1e-5)

    # Ragged spatial extent + multiple row blocks (exercises in-kernel masking).
    x2 = jax.random.normal(kx2, (2, 8, 13, 11), dtype=jnp.float32)
    out2 = cab_forward(x2, conv_w)
    jax.block_until_ready(out2)
    assert jnp.allclose(out2, cab_ref(x2, conv_w), rtol=1e-5, atol=1e-5)

    print("KERNEL_OK")
</pallas_src>

<mosaic_0001>
module attributes {stable_mosaic.version = 11 : i64} {
  func.func @_pool_kernel(%arg0: i32, %arg1: i32, %arg2: memref<8x256xf32, #tpu.memory_space<vmem>>, %arg3: memref<8x1xf32, #tpu.memory_space<vmem>>, %arg4: memref<8x1xf32, #tpu.memory_space<vmem>>, %arg5: memref<8x1xf32, #tpu.memory_space<vmem>>) attributes {dimension_semantics = [#tpu.dimension_semantics<parallel>, #tpu.dimension_semantics<arbitrary>], iteration_bounds = array<i64: 1, 1>, scalar_prefetch = 0 : i64, scratch_operands = 2 : i64, tpu.core_type = #tpu.core_type<tc>, window_params = [{transform_indices = @transform_0, window_bounds = array<i64: 8, 256>}, {transform_indices = @transform_1, window_bounds = array<i64: 8, 1>}]} {
    %c0_i32 = arith.constant 0 : i32
    %0 = arith.cmpi eq, %arg1, %c0_i32 : i32
    %1 = arith.extui %0 : i1 to i32
    %c0_i32_0 = arith.constant 0 : i32
    %2 = arith.cmpi ne, %1, %c0_i32_0 : i32
    scf.if %2 {
      %cst_13 = arith.constant 0.000000e+00 : f32
      %17 = vector.broadcast %cst_13 : f32 to vector<8x1xf32>
      %c0_14 = arith.constant 0 : index
      %c0_15 = arith.constant 0 : index
      %18 = vector.load %arg4[%c0_14, %c0_15] : memref<8x1xf32, #tpu.memory_space<vmem>>, vector<8x1xf32>
      tpu.vector_store %arg4[%c0_14, %c0_15], %17 {strides = array<i32>} : memref<8x1xf32, #tpu.memory_space<vmem>>, vector<8x1xf32>,
      %cst_16 = arith.constant 0xFF800000 : f32
      %19 = vector.broadcast %cst_16 : f32 to vector<8x1xf32>
      %c0_17 = arith.constant 0 : index
      %c0_18 = arith.constant 0 : index
      %20 = vector.load %arg5[%c0_17, %c0_18] : memref<8x1xf32, #tpu.memory_space<vmem>>, vector<8x1xf32>
      tpu.vector_store %arg5[%c0_17, %c0_18], %19 {strides = array<i32>} : memref<8x1xf32, #tpu.memory_space<vmem>>, vector<8x1xf32>,
    } else {
    }
    %c0 = arith.constant 0 : index
    %c0_1 = arith.constant 0 : index
    %3 = vector.load %arg2[%c0, %c0_1] : memref<8x256xf32, #tpu.memory_space<vmem>>, vector<8x256xf32>
    %c0_2 = arith.constant 0 : index
    %c0_3 = arith.constant 0 : index
    %4 = vector.load %arg4[%c0_2, %c0_3] : memref<8x1xf32, #tpu.memory_space<vmem>>, vector<8x1xf32>
    %cst = arith.constant dense<0.000000e+00> : vector<8xf32>
    %5 = vector.multi_reduction <add>, %3, %cst [1] : vector<8x256xf32> to vector<8xf32>
    %6 = vector.shape_cast %5 : vector<8xf32> to vector<8x1xf32>
    %7 = arith.addf %4, %6 : vector<8x1xf32>
    %c0_4 = arith.constant 0 : index
    %c0_5 = arith.constant 0 : index
    %8 = vector.load %arg4[%c0_4, %c0_5] : memref<8x1xf32, #tpu.memory_space<vmem>>, vector<8x1xf32>
    tpu.vector_store %arg4[%c0_4, %c0_5], %7 {strides = array<i32>} : memref<8x1xf32, #tpu.memory_space<vmem>>, vector<8x1xf32>,
    %c0_6 = arith.constant 0 : index
    %c0_7 = arith.constant 0 : index
    %9 = vector.load %arg5[%c0_6, %c0_7] : memref<8x1xf32, #tpu.memory_space<vmem>>, vector<8x1xf32>
    %cst_8 = arith.constant dense<0xFF800000> : vector<8xf32>
    %10 = vector.multi_reduction <maximumf>, %3, %cst_8 [1] : vector<8x256xf32> to vector<8xf32>
    %11 = vector.shape_cast %10 : vector<8xf32> to vector<8x1xf32>
    %12 = arith.maximumf %9, %11 : vector<8x1xf32>
    %c0_9 = arith.constant 0 : index
    %c0_10 = arith.constant 0 : index
    %13 = vector.load %arg5[%c0_9, %c0_10] : memref<8x1xf32, #tpu.memory_space<vmem>>, vector<8x1xf32>
    tpu.vector_store %arg5[%c0_9, %c0_10], %12 {strides = array<i32>} : memref<8x1xf32, #tpu.memory_space<vmem>>, vector<8x1xf32>,
    %c0_i32_11 = arith.constant 0 : i32
    %14 = arith.cmpi eq, %arg1, %c0_i32_11 : i32
    %15 = arith.extui %14 : i1 to i32
    %c0_i32_12 = arith.constant 0 : i32
    %16 = arith.cmpi ne, %15, %c0_i32_12 : i32
    scf.if %16 {
      %c0_13 = arith.constant 0 : index
      %c0_14 = arith.constant 0 : index
      %17 = vector.load %arg4[%c0_13, %c0_14] : memref<8x1xf32, #tpu.memory_space<vmem>>, vector<8x1xf32>
      %cst_15 = arith.constant 3.906250e-03 : f32
      %18 = vector.broadcast %cst_15 : f32 to vector<8x1xf32>
      %19 = arith.mulf %17, %18 : vector<8x1xf32>
      %c0_16 = arith.constant 0 : index
      %c0_17 = arith.constant 0 : index
      %20 = vector.load %arg5[%c0_16, %c0_17] : memref<8x1xf32, #tpu.memory_space<vmem>>, vector<8x1xf32>
      %21 = arith.addf %19, %20 : vector<8x1xf32>
      %c0_18 = arith.constant 0 : index
      %c0_19 = arith.constant 0 : index
      %22 = vector.load %arg3[%c0_18, %c0_19] : memref<8x1xf32, #tpu.memory_space<vmem>>, vector<8x1xf32>
      tpu.vector_store %arg3[%c0_18, %c0_19], %21 {strides = array<i32>} : memref<8x1xf32, #tpu.memory_space<vmem>>, vector<8x1xf32>,
    } else {
    }
    return
  }
  func.func @transform_0(%arg0: i32, %arg1: i32) -> (i32, i32) {
    %c0_i32 = arith.constant 0 : i32
    return %arg0, %arg1 : i32, i32
  }
  func.func @transform_1(%arg0: i32, %arg1: i32) -> (i32, i32) {
    %c0_i32 = arith.constant 0 : i32
    %c0_i32_0 = arith.constant 0 : i32
    return %arg0, %c0_i32 : i32, i32
  }
}

</mosaic_0001>

<bundles_post_ra>
// kernel: tpu_custom_call.1
= control target key start
LH: loop header
LB: loop body
LE: loop exit
PB: predicated region body
PF: predicated region fallthrough
CT: control target
= control target key end

     0   :  { %6 = vsyncpa [#allocation5], 0  ;;  %s86_s9 = smov [#allocation4]   ;;  %s110_s0 = inlined_call_operand.hbm [shape: f32[8,256], index: 0, kind: input, shape index: {}]   ;;  %s111_s1 = inlined_call_operand.vmem [shape: f32[8,1], index: 1, kind: output, shape index: {}]  }
   0x1   :  { %s12_s8 = sshll.u32 %s110_s0, 4  ;;  %s14_s10 = sshll.u32 %s86_s9, 4  ;;  %s13_s8 = int_to_ptr.hbm [resolvable:$true] %s12_s8  ;;  %s15_s10 = int_to_ptr.vmem [resolvable:$true] %s14_s10 }
   0x2   :  { %17 = dma.hbm_to_vmem [thread:$0]  %s13_s8, 256, %s15_s10, [#allocation5]  }
   0x3   :  { %84 = dma.done.wait [#allocation5], 256  }
   0x4   :  { %85 = vsyncadd [#allocation5], 4294967040  ;;  %vm26_vm0 = vcmask 7168   ;;  %v87_v0 = vmov 0.0   ;;  %v29_v1 = vld [vmem:[#allocation4] sm:$0xff]  ;;  %v30_v2 = vld [vmem:[#allocation4 + $0x8] sm:$0xff] }
   0x5   :  { %27 = vst.msk [vmem:[#allocation2] sm:$0xff] %vm26_vm0, %v87_v0  ;;  %v32_v3 = vadd.f32 %v30_v2, %v29_v1  ;;  %v39_v4 = vmax.f32 %v29_v1, %v30_v2  ;;  %v88_v5 = vmov -inf  }
   0x6   :  { %28 = vst.msk [vmem:[#allocation3] sm:$0xff] %vm26_vm0, %v88_v5 }
   0x7   :  { %33 = vadd.xlane.f32.xlu0 %v32_v3 }
   0xc   :  { %v31_v6 = vld [vmem:[#allocation2] sm:$0xff] }
   0xd   :  { %v38_v9 = vld [vmem:[#allocation3] sm:$0xff] }
   0xf   :  { %40 = vmax.xlane.f32.xlu0 %v39_v4 }
  0x7a   :  { %v34_v7 = vpop.xlane.xlu0 %33 }
  0x7b   :  { %v35_v8 = vadd.f32 %v34_v7, %v31_v6 }
  0x7d   :  { %37 = vst.msk [vmem:[#allocation2] sm:$0xff] %vm26_vm0, %v35_v8 }
  0x82   :  { %v41_v10 = vpop.xlane.xlu0 %40 }
  0x83   :  { %v42_v11 = vmax.f32 %v38_v9, %v41_v10 }
  0x84   :  { %v47_v12 = vld [vmem:[#allocation2] sm:$0xff] }
  0x85   :  { %43 = vst.msk [vmem:[#allocation3] sm:$0xff] %vm26_vm0, %v42_v11  ;;  %v48_v13 = vmul.f32 0.00390625, %v47_v12 }
  0x8c   :  { %v49_v14 = vld [vmem:[#allocation3] sm:$0xff] }
  0x8d   :  { %v50_v15 = vadd.f32 %v49_v14, %v48_v13 }
  0x8f   :  { %51 = vst.msk [vmem:[%s111_s1] sm:$0xff] %vm26_vm0, %v50_v15 }
  0x90   :  { %56 = vsyncpa [#allocation5], 1 }

</bundles_post_ra>
